<compile_context>
chip_gen: v6e
topology: v6e:2x2x1
jax: 0.10.0
libtpu: 0.0.40
codegen_flags: <defaults>
</compile_context>

<pallas_src>
import jax
import jax.numpy as jnp
from jax.experimental import pallas as pl
from jax.experimental.pallas import tpu as pltpu

_VMEM_BUDGET_BYTES = 40 * 1024 * 1024   # working-set budget used for tile selection
_VMEM_LIMIT_BYTES = 48 * 1024 * 1024    # scoped VMEM limit handed to Mosaic
_MAX_BATCH_TILE = 1024                  # 512-1024 row tiles already sit near HBM roofline


def _round_up(x, m):
    return ((x + m - 1) // m) * m


def _linear_kernel(x_ref, wt_ref, b_ref, o_ref):
    # x_ref: (TB, D) f32, wt_ref: (D, C_pad), b_ref: (1, C_pad) f32, o_ref: (TB, C_pad) f32
    x = x_ref[...]
    w = wt_ref[...]
    if x.dtype != w.dtype:
        x = x.astype(w.dtype)  # in-kernel cast (VPU); x stays f32 in HBM
    acc = jnp.dot(x, w, preferred_element_type=jnp.float32)
    o_ref[...] = (acc + b_ref[...]).astype(o_ref.dtype)


def _pick_batch_tile(D, C_pad, w_bytes, budget_bytes=_VMEM_BUDGET_BYTES):
    """Largest 8-aligned batch tile whose VMEM working set fits the budget.

    Working set = resident weight+bias (single-buffered) + double-buffered f32 x
    tile + double-buffered f32 output tile.
    """
    fixed = C_pad * D * w_bytes + C_pad * 4            # single-buffered weight + bias
    per_row = 2 * D * 4 + 2 * C_pad * 4                # x tile (x2 bufs) + out tile (x2 bufs)
    avail = budget_bytes - fixed
    if avail < 8 * per_row:
        # TODO(synk): split D across a reduction grid axis with a scratch accumulator.
        raise ValueError(
            f"input_dim={D} too large to keep the ({C_pad}, {D}) weight resident in "
            f"VMEM ({fixed} B of a {budget_bytes} B budget)."
        )
    tb = avail // per_row
    return int(max(8, min(_MAX_BATCH_TILE, (tb // 8) * 8)))


def linear_classifier_forward(x, weight, bias, *, block_b=None, use_bf16=False,
                              return_padded=False):
    """y = x @ weight.T + bias, matching nn.Linear semantics.

    x:      (B, D)  float32
    weight: (C, D)  float32  (nn.Linear layout)
    bias:   (C,)    float32
    returns (B, C) float32   (or (B, C_pad) if return_padded=True)
    """
    B, D = x.shape
    C, D2 = weight.shape
    assert D == D2 and bias.shape == (C,)

    # Lane-dense output: pad the class dim to a multiple of 128 lanes.
    C_pad = _round_up(max(C, 128), 128)

    w_dtype = jnp.bfloat16 if use_bf16 else weight.dtype
    w_bytes = jnp.dtype(w_dtype).itemsize

    tb = block_b if block_b is not None else _pick_batch_tile(D, C_pad, w_bytes)
    # Never allocate a tile larger than the (8-aligned) batch itself ...
    TB = min(tb, _round_up(B, 8))
    # ... and keep >= 2 grid steps whenever possible so both v7x TCs get work.
    if B > 8:
        TB = min(TB, _round_up(pl.cdiv(B, 2), 8))
    TB = max(8, (TB // 8) * 8)

    # One-time weight prep (amortized over the whole batch): cast, pad classes,
    # transpose to (D, C_pad) so the kernel never transposes the resident block.
    wp = weight.astype(w_dtype)
    if C_pad != C:
        wp = jnp.pad(wp, ((0, C_pad - C), (0, 0)))
        bp = jnp.pad(bias, (0, C_pad - C))
    else:
        bp = bias
    wt = wp.T                                            # (D, C_pad)
    bp = bp.astype(jnp.float32).reshape(1, C_pad)

    grid = (pl.cdiv(B, TB),)                             # ragged last block handled by Pallas
    out = pl.pallas_call(
        _linear_kernel,
        out_shape=jax.ShapeDtypeStruct((B, C_pad), jnp.float32),
        grid=grid,
        in_specs=[
            pl.BlockSpec((TB, D), lambda i: (i, 0)),                     # streamed x tiles
            pl.BlockSpec((D, C_pad), lambda i: (0, 0),
                         pipeline_mode=pl.Buffered(1)),                  # resident weight
            pl.BlockSpec((1, C_pad), lambda i: (0, 0),
                         pipeline_mode=pl.Buffered(1)),                  # resident bias
        ],
        out_specs=pl.BlockSpec((TB, C_pad), lambda i: (i, 0)),
        compiler_params=pltpu.CompilerParams(
            dimension_semantics=("parallel",),           # batch tiles split across TCs
            vmem_limit_bytes=_VMEM_LIMIT_BYTES,
        ),
    )(x, wt, bp)

    if return_padded:
        return out       # (B, C_pad): lets the consumer fuse the class slice
    return out[:, :C]


if __name__ == "__main__":
    # Small shapes consistent with the module: LinearClassifier(input_dim=32, num_classes=10)
    batch, input_dim, num_classes = 8, 32, 10

    key = jax.random.PRNGKey(0)
    kx, kw, kb = jax.random.split(key, 3)

    # Deterministic params mimicking nn.Linear's U(-1/sqrt(D), 1/sqrt(D))
    bound = 1.0 / (input_dim ** 0.5)
    weight = jax.random.uniform(kw, (num_classes, input_dim), jnp.float32, -bound, bound)
    bias = jax.random.uniform(kb, (num_classes,), jnp.float32, -bound, bound)
    x = jax.random.normal(kx, (batch, input_dim), jnp.float32)

    y = jax.block_until_ready(linear_classifier_forward(x, weight, bias))
    y_ref = x @ weight.T + bias
    assert y.shape == (batch, num_classes)
    assert jnp.allclose(y, y_ref, atol=1e-5, rtol=1e-5)

    # Multi-step grid with a ragged last block (no batch padding, no batch slice).
    B2, D2, C2 = 270, 256, 10
    k2x, k2w, k2b = jax.random.split(jax.random.PRNGKey(1), 3)
    w2 = jax.random.uniform(k2w, (C2, D2), jnp.float32, -0.06, 0.06)
    b2 = jax.random.uniform(k2b, (C2,), jnp.float32, -0.06, 0.06)
    x2 = jax.random.normal(k2x, (B2, D2), jnp.float32)
    y2_ref = x2 @ w2.T + b2

    y2 = jax.block_until_ready(linear_classifier_forward(x2, w2, b2, block_b=128))
    assert y2.shape == (B2, C2)
    assert jnp.allclose(y2, y2_ref, atol=1e-2, rtol=1e-2)

    # Auto tile selection (>= 2 grid steps) + bf16-weight path (x cast in-kernel).
    y3 = jax.block_until_ready(linear_classifier_forward(x2, w2, b2))
    assert jnp.allclose(y3, y2_ref, atol=1e-2, rtol=1e-2)
    y4 = jax.block_until_ready(linear_classifier_forward(x2, w2, b2, use_bf16=True))
    assert jnp.allclose(y4, y2_ref, atol=3e-2, rtol=3e-2)

    print("KERNEL_OK")
</pallas_src>

<mosaic_0001>
module attributes {stable_mosaic.version = 11 : i64} {
  func.func @_linear_kernel(%arg0: i32, %arg1: memref<8x32xf32, #tpu.memory_space<vmem>>, %arg2: memref<32x128xf32, #tpu.memory_space<vmem>>, %arg3: memref<1x128xf32, #tpu.memory_space<vmem>>, %arg4: memref<8x128xf32, #tpu.memory_space<vmem>>) attributes {dimension_semantics = [#tpu.dimension_semantics<parallel>], iteration_bounds = array<i64: 1>, scalar_prefetch = 0 : i64, scratch_operands = 0 : i64, tpu.core_type = #tpu.core_type<tc>, window_params = [{transform_indices = @transform_0, window_bounds = array<i64: 8, 32>}, {pipeline_mode = #tpu.pipeline_mode<synchronous>, transform_indices = @transform_1, window_bounds = array<i64: 32, 128>}, {pipeline_mode = #tpu.pipeline_mode<synchronous>, transform_indices = @transform_2, window_bounds = array<i64: 1, 128>}, {transform_indices = @transform_3, window_bounds = array<i64: 8, 128>}]} {
    %c0 = arith.constant 0 : index
    %c0_0 = arith.constant 0 : index
    %0 = vector.load %arg1[%c0, %c0_0] : memref<8x32xf32, #tpu.memory_space<vmem>>, vector<8x32xf32>
    %c0_1 = arith.constant 0 : index
    %c0_2 = arith.constant 0 : index
    %1 = vector.load %arg2[%c0_1, %c0_2] : memref<32x128xf32, #tpu.memory_space<vmem>>, vector<32x128xf32>
    %cst = arith.constant dense<0.000000e+00> : vector<8x128xf32>
    %2 = tpu.matmul %0, %1, %cst {dimension_numbers = #tpu.dot_dimension_numbers<[1], [0], [0], [1], [0, 0, 1, 1], [], []>} : vector<8x32xf32>, vector<32x128xf32>, vector<8x128xf32> -> vector<8x128xf32>
    %c0_3 = arith.constant 0 : index
    %c0_4 = arith.constant 0 : index
    %3 = vector.load %arg3[%c0_3, %c0_4] : memref<1x128xf32, #tpu.memory_space<vmem>>, vector<1x128xf32>
    %4 = vector.broadcast %3 : vector<1x128xf32> to vector<8x128xf32>
    %5 = arith.addf %2, %4 : vector<8x128xf32>
    %c0_5 = arith.constant 0 : index
    %c0_6 = arith.constant 0 : index
    %6 = vector.load %arg4[%c0_5, %c0_6] : memref<8x128xf32, #tpu.memory_space<vmem>>, vector<8x128xf32>
    tpu.vector_store %arg4[%c0_5, %c0_6], %5 {strides = array<i32>} : memref<8x128xf32, #tpu.memory_space<vmem>>, vector<8x128xf32>,
    return
  }
  func.func @transform_0(%arg0: i32) -> (i32, i32) {
    %c0_i32 = arith.constant 0 : i32
    %c0_i32_0 = arith.constant 0 : i32
    return %arg0, %c0_i32 : i32, i32
  }
  func.func @transform_1(%arg0: i32) -> (i32, i32) {
    %c0_i32 = arith.constant 0 : i32
    %c0_i32_0 = arith.constant 0 : i32
    %c0_i32_1 = arith.constant 0 : i32
    return %c0_i32, %c0_i32_0 : i32, i32
  }
  func.func @transform_2(%arg0: i32) -> (i32, i32) {
    %c0_i32 = arith.constant 0 : i32
    %c0_i32_0 = arith.constant 0 : i32
    %c0_i32_1 = arith.constant 0 : i32
    return %c0_i32, %c0_i32_0 : i32, i32
  }
  func.func @transform_3(%arg0: i32) -> (i32, i32) {
    %c0_i32 = arith.constant 0 : i32
    %c0_i32_0 = arith.constant 0 : i32
    return %arg0, %c0_i32 : i32, i32
  }
}

</mosaic_0001>

<bundles_post_ra>
// kernel: tpu_custom_call.1
= control target key start
LH: loop header
LB: loop body
LE: loop exit
PB: predicated region body
PF: predicated region fallthrough
CT: control target
= control target key end

     0   :  { %8 = vsyncpa [#allocation3], 0  ;;  %s274_s0 = inlined_call_operand.hbm [shape: f32[8,32], index: 0, kind: input, shape index: {}]   ;;  %s275_s1 = inlined_call_operand.hbm [shape: f32[32,128], index: 1, kind: input, shape index: {}]   ;;  %s276_s2 = inlined_call_operand.vmem [shape: f32[1,128], index: 2, kind: input, shape index: {}]   ;;  %s277_s3 = inlined_call_operand.hbm [shape: f32[8,128], index: 3, kind: output, shape index: {}]  }
   0x1   :  { %9 = vsyncpa [#allocation6], 0 }
   0x2   :  { %10 = vsyncpa [#allocation4], 0  ;;  %s235_s12 = smov [#allocation2]   ;;  %s236_s14 = smov [#allocation5]  }
   0x3   :  { %s17_s13 = sshll.u32 %s235_s12, 4  ;;  %s26_s15 = sshll.u32 %s236_s14, 4  ;;  %s18_s13 = int_to_ptr.vmem [resolvable:$true] %s17_s13  ;;  %s27_s15 = int_to_ptr.vmem [resolvable:$true] %s26_s15 }
   0x4   :  { %s177_s16 = scalar_lea.vmem %s18_s13, 128  ;;  %p182_p1 = scmp.lt.s32.totalorder %s18_s13, %s18_s13 }
   0x5   :  { %p178_p0 = scmp.ne.s32.totalorder %s18_s13, %s177_s16  ;;  %p183_p2 = scmp.lt.s32.totalorder %s177_s16, %s177_s16 }
   0x7   :  { %p184_p3 = por %p183_p2, %p182_p1 }
   0x9   :  { %p185_p4 = pnand %p184_p3, %p178_p0 }
   0xb   :  { %188 = shalt.err (!%p185_p4)
}
   0xc   :  { %20 = dma.hbm_to_vmem [thread:$0]  %s274_s0, 128, %s18_s13, [#allocation3]  }
   0xd   :  { %s197_s19 = scalar_lea.vmem %s27_s15, 512  ;;  %p202_p6 = scmp.lt.s32.totalorder %s27_s15, %s27_s15 }
   0xe   :  { %p198_p5 = scmp.ne.s32.totalorder %s27_s15, %s197_s19  ;;  %p203_p7 = scmp.lt.s32.totalorder %s197_s19, %s197_s19 }
  0x10   :  { %p204_p8 = por %p203_p7, %p202_p6 }
  0x12   :  { %p205_p9 = pnand %p204_p8, %p198_p5 }
  0x14   :  { %208 = shalt.err (!%p205_p9)
}
  0x15   :  { %s237_s20 = smov 128   ;;  %s238_s21 = smov 8  }
  0x16   :  { %32 = dma.hbm_to_vmem [thread:$0]  %s275_s1, 512, %s27_s15, [#allocation6], %s237_s20, %s237_s20, %s238_s21  }
  0x17   :  { %229 = dma.done.wait [#allocation3], 128  }
  0x18   :  { %230 = vsyncadd [#allocation3], 4294967168 }
  0x19   :  { %231 = dma.done.wait [#allocation6], 512  }
  0x1a   :  { %232 = vsyncadd [#allocation6], 4294966784  ;;  %v239_v0 = vmov 0.0   ;;  %vm240_vm0 = vmmov 0   ;;  %v45_v1 = vld [vmem:[#allocation5 + $0x18] sm:$0xff]  ;;  %v44_v2 = vld [vmem:[#allocation5 + $0x10] sm:$0xff] }
  0x1b   :  { %151 = vmatprep.subr.mxu0 %v239_v0  ;;  %159 = vmatprep.mubr.msk.f32.mxu0 %vm240_vm0, %v239_v0  ;;  %v43_v3 = vld [vmem:[#allocation5 + $0x8] sm:$0xff]  ;;  %v42_v4 = vld [vmem:[#allocation5] sm:$0xff]  ;;  %v41_v5 = vld [vmem:[#allocation2] sm:$0xff]  ;;  %vm53_vm1 = vcmask 261120   ;;  %s241_s24 = smov [#allocation7]  }
  0x1c   :  { %152 = vmatpush3.msra.mxu0 %v45_v1  ;;  %v144_v6 = vld [vmem:[%s276_s2] ss:$0 sm:$0xff]  ;;  %s134_s25 = sshll.u32 %s241_s24, 4  ;;  %s135_s25 = int_to_ptr.vmem [resolvable:$true] %s134_s25 }
  0x1d   :  { %153 = vmatprep.subr.mxu0 %v239_v0  ;;  %s209_s26 = scalar_lea.vmem %s135_s25, 128  ;;  %p214_p11 = scmp.lt.s32.totalorder %s135_s25, %s135_s25 }
  0x1e   :  { %154 = vmatpush3.msra.mxu0 %v44_v2  ;;  %p210_p10 = scmp.ne.s32.totalorder %s135_s25, %s209_s26  ;;  %p215_p12 = scmp.lt.s32.totalorder %s209_s26, %s209_s26 }
  0x1f   :  { %155 = vmatprep.subr.mxu0 %v239_v0 }
  0x20   :  { %156 = vmatpush3.msra.mxu0 %v43_v3  ;;  %p216_p13 = por %p215_p12, %p214_p11 }
  0x21   :  { %157 = vmatprep.subr.mxu0 %v239_v0 }
  0x22   :  { %158 = vmatpush3.msra.mxu0 %v42_v4  ;;  %p217_p0 = pnand %p216_p13, %p210_p10 }
  0x23   :  { %160 = vmatmul.mubr.msk.f32.vlgmr.msra.gmra.mxu0 %vm53_vm1, %v41_v5 }
  0xe3   :  { %v123_v7 = vpop.f32.mrf.mxu0 }
  0xe4   :  { %v124_v8 = vadd.f32 %v144_v6, %v123_v7 }
  0xe5   :  { %v161_v9 = vpop.f32.mrf.mxu0 }
  0xe6   :  { %127 = vst [vmem:[#allocation7] sm:$0xff] %v124_v8 }
  0xe7   :  { %220 = shalt.err (!%p217_p0)
}
  0xe8   :  { %137 = dma.vmem_to_hbm [thread:$0]  %s135_s25, 128, %s277_s3, [#allocation4]  }
  0xe9   :  { %233 = dma.done.wait [#allocation4], 128  }
  0xea   :  { %234 = vsyncadd [#allocation4], 4294967168 }
  0xeb   :  { %141 = vsyncpa [#allocation3], 1 }
  0xec   :  { %142 = vsyncpa [#allocation6], 1 }
  0xed   :  { %143 = vsyncpa [#allocation4], 1 }

</bundles_post_ra>
